<compile_context>
chip_gen: v7x
topology: tpu7x:2x2x1
jax: 0.10.0
libtpu: 0.0.40
codegen_flags: <defaults>
</compile_context>

<pallas_src>
import functools

import jax
import jax.numpy as jnp
from jax.experimental import pallas as pl
from jax.experimental.pallas import tpu as pltpu


# ----------------------------------------------------------------------------
# Layout constants
# ----------------------------------------------------------------------------
NODE_TILE = 16    # node-row padding -> (16, 128) bf16 sublane/lane tile for MXU operands
GRAPH_TILE = 8    # graph-row padding (sublane tile)
ROW_EXTRA = 32    # slab page 0: row where the [label | noise] block of W_pre starts (8-aligned)
ROW_BIAS = 120    # slab page 0: row holding b_post (8-aligned)


def _round_up(v, m):
    return ((v + m - 1) // m) * m


def _full_spec(shape):
    # No grid -> whole array as a single VMEM block.
    return pl.BlockSpec(shape, lambda: (0,) * len(shape))


def _prelu(h, alpha):
    return jnp.where(h > 0, h, alpha * h)


# ----------------------------------------------------------------------------
# Fused Pallas kernel: (gather+concat) -> pre_mp -> GCN x2 -> post_mp, all in VMEM
# ----------------------------------------------------------------------------
def _gcn_layer(adj_bf, h, w_bf, alpha):
    """GCNConv (bias=False, Ahat pre-normalized) + PReLU.

    bf16 MXU operands, f32 accumulation, f32 element-wise epilogue.
    Matmul order chosen statically (trace time) to minimize the N^2 term.
    """
    f_in, f_out = h.shape[-1], w_bf.shape[-1]
    h_bf = h.astype(jnp.bfloat16)
    if f_in <= f_out:
        agg = jnp.dot(adj_bf, h_bf, preferred_element_type=jnp.float32)
        out = jnp.dot(agg.astype(jnp.bfloat16), w_bf, preferred_element_type=jnp.float32)
    else:
        hw = jnp.dot(h_bf, w_bf, preferred_element_type=jnp.float32)
        out = jnp.dot(adj_bf, hw.astype(jnp.bfloat16), preferred_element_type=jnp.float32)
    return _prelu(out, alpha)


def generator_kernel(alphas_ref, x_ref, bidx_ref, gx_ref, adj_ref, w_ref, o_ref,
                     *, f_x, f_extra):
    f32, bf16 = jnp.float32, jnp.bfloat16
    n_pad = x_ref.shape[0]
    g_pad = gx_ref.shape[0]

    w0 = w_ref[0]                                    # bf16 (128,128): W_pre rows + b_post row
    w_px = w0[:f_x, :]                               # W_pre rows for the raw node features
    w_pe = w0[ROW_EXTRA:ROW_EXTRA + f_extra, :]      # W_pre rows for [label | noise]
    b_post = w0[ROW_BIAS:ROW_BIAS + 1, :].astype(f32)

    # --- fused glue: propagate_over_batches + concat, as a one-hot gather-matmul ---
    # padded node rows carry graph id -1 -> all-zero one-hot row -> zero contribution
    gids = jax.lax.broadcasted_iota(jnp.int32, (n_pad, g_pad), 1)
    onehot = (bidx_ref[...] == gids).astype(f32)                          # (n_pad, g_pad)
    g_emb = jnp.dot(gx_ref[...].astype(bf16), w_pe,
                    preferred_element_type=f32)                           # (g_pad, 128)

    # --- pre_mp: Linear(bias=False) over concat([x, label, noise]) as a split matmul ---
    h = (jnp.dot(x_ref[...].astype(bf16), w_px, preferred_element_type=f32)
         + jnp.dot(onehot, g_emb, preferred_element_type=f32))            # exact row select
    h = _prelu(h, alphas_ref[0])

    # --- two GCNConv + PReLU message-passing layers (Ahat resident, cast once) ---
    adj_bf = adj_ref[...].astype(bf16)
    h = _gcn_layer(adj_bf, h, w_ref[1], alphas_ref[1])
    h = _gcn_layer(adj_bf, h, w_ref[2], alphas_ref[2])

    # --- post_mp: Linear(bias=True), output lane-padded to 128 (unmasked vst) ---
    o_ref[...] = jnp.dot(h.astype(bf16), w_ref[3], preferred_element_type=f32) + b_post


# ----------------------------------------------------------------------------
# One-time preprocessing (outside the per-call path)
# ----------------------------------------------------------------------------
def pack_params(params, dim_x):
    """Pack all weights + bias into one (4, d_hid, d_hid) bf16 slab and alphas into (3,) f32."""
    w_pre, w_mp0, w_mp1 = params["w_pre"], params["w_mp0"], params["w_mp1"]
    w_post, b_post = params["w_post"], params["b_post"]
    d_hid = w_pre.shape[1]
    f_extra = w_pre.shape[0] - dim_x
    dim_out = w_post.shape[1]
    assert d_hid % 128 == 0 and w_mp0.shape == (d_hid, d_hid) and w_mp1.shape == (d_hid, d_hid)
    assert dim_x <= ROW_EXTRA and ROW_EXTRA + f_extra <= ROW_BIAS and dim_out <= d_hid

    page0 = jnp.zeros((d_hid, d_hid), jnp.float32)
    page0 = page0.at[:dim_x].set(w_pre[:dim_x])                          # raw-feature rows
    page0 = page0.at[ROW_EXTRA:ROW_EXTRA + f_extra].set(w_pre[dim_x:])   # [label|noise] rows
    page0 = page0.at[ROW_BIAS, :dim_out].set(b_post)                     # post_mp bias row
    page3 = jnp.zeros((d_hid, d_hid), jnp.float32).at[:, :dim_out].set(w_post)

    w_slab = jnp.stack([page0, w_mp0, w_mp1, page3]).astype(jnp.bfloat16)
    alphas = jnp.stack(
        [params["alpha_pre"], params["alpha_mp0"], params["alpha_mp1"]]).astype(jnp.float32)
    return {"w_slab": w_slab, "alphas": alphas}


def gcn_norm_adj(edge_index, num_nodes, pad_to=None):
    """Dense Ahat matching PyG GCNConv (add_self_loops=True, normalize=True)."""
    src, tgt = edge_index
    adj = jnp.zeros((num_nodes, num_nodes), jnp.float32).at[tgt, src].add(1.0)
    adj = adj + jnp.eye(num_nodes, dtype=jnp.float32)
    deg = adj.sum(axis=1)
    dinv = jnp.where(deg > 0, 1.0 / jnp.sqrt(deg), 0.0)
    adj = adj * dinv[:, None] * dinv[None, :]
    if pad_to is not None and pad_to > num_nodes:
        adj = jnp.pad(adj, ((0, pad_to - num_nodes),) * 2)
    return adj


# ----------------------------------------------------------------------------
# Forward wrapper: tiny pads + one pallas_call
# ----------------------------------------------------------------------------
def _fused_cost(n_pad, g_pad, f_x, f_extra, d_hid):
    flops = 2 * g_pad * f_extra * d_hid            # per-graph [label|noise] embedding
    flops += 2 * n_pad * f_x * d_hid               # pre_mp (raw-feature part)
    flops += 2 * n_pad * g_pad * d_hid             # one-hot gather matmul
    flops += 2 * (2 * n_pad * n_pad * d_hid + 2 * n_pad * d_hid * d_hid)  # 2 GCN layers
    flops += 2 * n_pad * d_hid * d_hid             # post_mp
    bytes_acc = 4 * (3 + n_pad * f_x + n_pad + g_pad * f_extra
                     + n_pad * n_pad + n_pad * d_hid)
    bytes_acc += 2 * (4 * d_hid * d_hid)           # bf16 weight slab
    return flops, bytes_acc


@functools.partial(jax.jit, static_argnames=("dim_out",))
def gan_generator_forward(x, batch_vec, adj_norm, noise, desired_label, w_slab, alphas,
                          *, dim_out):
    """Equivalent of GANgeneratorGNN.forward(batch, noise, desired_label)."""
    n, dim_x = x.shape
    n_graphs, dim_noise = noise.shape
    label2d = desired_label.reshape(n_graphs, -1).astype(jnp.float32)
    f_extra = label2d.shape[1] + dim_noise
    d_hid = w_slab.shape[-1]

    n_pad = _round_up(n, NODE_TILE)
    g_pad = _round_up(n_graphs, GRAPH_TILE)

    # Tiny per-call glue; everything heavy is pre-packed or fused in the kernel.
    x_p = jnp.pad(x.astype(jnp.float32), ((0, n_pad - n), (0, 0)))
    batch_col = jnp.pad(batch_vec.astype(jnp.int32), (0, n_pad - n),
                        constant_values=-1).reshape(n_pad, 1)
    g_extra = jnp.pad(jnp.concatenate([label2d, noise.astype(jnp.float32)], axis=1),
                      ((0, g_pad - n_graphs), (0, 0)))
    if adj_norm.shape != (n_pad, n_pad):
        adj_norm = jnp.pad(adj_norm.astype(jnp.float32),
                           ((0, n_pad - adj_norm.shape[0]),
                            (0, n_pad - adj_norm.shape[1])))

    flops, bytes_acc = _fused_cost(n_pad, g_pad, dim_x, f_extra, d_hid)
    kernel = functools.partial(generator_kernel, f_x=dim_x, f_extra=f_extra)

    out = pl.pallas_call(
        kernel,
        out_shape=jax.ShapeDtypeStruct((n_pad, d_hid), jnp.float32),
        in_specs=[
            pl.BlockSpec(memory_space=pltpu.MemorySpace.SMEM),   # PReLU alphas (scalars)
            _full_spec(x_p.shape),                               # raw node features
            _full_spec(batch_col.shape),                         # per-node graph id
            _full_spec(g_extra.shape),                           # per-graph [label | noise]
            _full_spec(adj_norm.shape),                          # normalized dense Ahat
            _full_spec(w_slab.shape),                            # packed bf16 weights + bias
        ],
        out_specs=_full_spec((n_pad, d_hid)),
        cost_estimate=pl.CostEstimate(flops=flops, transcendentals=0,
                                      bytes_accessed=bytes_acc),
    )(alphas, x_p, batch_col, g_extra, adj_norm, w_slab)

    return out[:n, :dim_out]


# ----------------------------------------------------------------------------
# Pure-JAX references
# ----------------------------------------------------------------------------
def ref_forward_f32(x, batch_vec, adj, noise, desired_label, params):
    """Module semantics in f32 (PyTorch-equivalent math)."""
    label2d = desired_label.reshape(desired_label.shape[0], -1).astype(jnp.float32)
    node_extra = jnp.concatenate([label2d, noise], axis=1)[batch_vec]
    h = jnp.concatenate([x, node_extra], axis=1)
    h = _prelu(h @ params["w_pre"], params["alpha_pre"])
    h = _prelu(adj @ (h @ params["w_mp0"]), params["alpha_mp0"])
    h = _prelu(adj @ (h @ params["w_mp1"]), params["alpha_mp1"])
    return h @ params["w_post"] + params["b_post"][None, :]


def ref_forward_bf16_matched(x, batch_vec, adj, noise, desired_label, params):
    """Same math with the kernel's bf16-on-MXU / f32-accumulation numerics."""
    bf = lambda a: a.astype(jnp.bfloat16)
    f32 = jnp.float32
    dim_x = x.shape[1]
    label2d = desired_label.reshape(desired_label.shape[0], -1).astype(f32)
    g_extra = jnp.concatenate([label2d, noise.astype(f32)], axis=1)
    g_emb = jnp.dot(bf(g_extra), bf(params["w_pre"][dim_x:]), preferred_element_type=f32)
    h = (jnp.dot(bf(x), bf(params["w_pre"][:dim_x]), preferred_element_type=f32)
         + g_emb[batch_vec])
    h = _prelu(h, params["alpha_pre"])
    adj_bf = bf(adj)
    for w_key, a_key in (("w_mp0", "alpha_mp0"), ("w_mp1", "alpha_mp1")):
        agg = jnp.dot(adj_bf, bf(h), preferred_element_type=f32)
        h = _prelu(jnp.dot(bf(agg), bf(params[w_key]), preferred_element_type=f32),
                   params[a_key])
    return (jnp.dot(bf(h), bf(params["w_post"]), preferred_element_type=f32)
            + params["b_post"].astype(jnp.bfloat16).astype(f32)[None, :])


# ----------------------------------------------------------------------------
# Main
# ----------------------------------------------------------------------------
if __name__ == "__main__":
    key = jax.random.PRNGKey(0)

    # Synthetic GNNNetworkConfig
    BASE_DIM, DIM_LABEL, DIM_NOISE = 19, 1, 12
    DIM_IN = BASE_DIM + DIM_LABEL + DIM_NOISE            # 32
    DIM_HID = 128
    DIM_OUT = 7                                          # e.g. xyz + quaternion
    N_NODES, N_GRAPHS = 10, 2

    # Two small graphs: 6-node ring + 4-node ring.
    batch_vec = jnp.array([0] * 6 + [1] * 4, dtype=jnp.int32)

    def ring_edges(offset, n):
        s = [offset + i for i in range(n)]
        t = [offset + (i + 1) % n for i in range(n)]
        return list(zip(s, t)) + list(zip(t, s))

    edge_index = jnp.array(ring_edges(0, 6) + ring_edges(6, 4), dtype=jnp.int32).T

    # Inputs: node features, per-graph noise (GANgeneratorGNN.sample_noise), desired labels.
    key, kx, kn = jax.random.split(key, 3)
    x = jax.random.normal(kx, (N_NODES, BASE_DIM), dtype=jnp.float32)
    noise = jax.random.normal(kn, (N_GRAPHS, DIM_NOISE), dtype=jnp.float32)
    desired_label = jnp.array([1.0, 0.0], dtype=jnp.float32)

    # Deterministic synthetic parameters (not a checkpoint load).
    def _w(k, fan_in, fan_out):
        return jax.random.normal(k, (fan_in, fan_out), dtype=jnp.float32) * (
            1.0 / jnp.sqrt(float(fan_in)))

    key, k1, k2, k3, k4, k5 = jax.random.split(key, 6)
    params = {
        "w_pre": _w(k1, DIM_IN, DIM_HID),
        "alpha_pre": jnp.float32(0.25),      # nn.PReLU default
        "w_mp0": _w(k2, DIM_HID, DIM_HID),
        "alpha_mp0": jnp.float32(0.25),
        "w_mp1": _w(k3, DIM_HID, DIM_HID),
        "alpha_mp1": jnp.float32(0.25),
        "w_post": _w(k4, DIM_HID, DIM_OUT),
        "b_post": jax.random.normal(k5, (DIM_OUT,), dtype=jnp.float32) * 0.01,
    }

    # One-time preprocessing: padded normalized adjacency + packed bf16 weight slab.
    adj_norm = gcn_norm_adj(edge_index, N_NODES, pad_to=_round_up(N_NODES, NODE_TILE))
    packed = pack_params(params, dim_x=BASE_DIM)

    # Fused Pallas forward.
    out = gan_generator_forward(x, batch_vec, adj_norm, noise, desired_label,
                                packed["w_slab"], packed["alphas"], dim_out=DIM_OUT)
    out = jax.block_until_ready(out)

    # References: tight check vs bf16-matched numerics, loose sanity vs pure-f32 module math.
    adj_ref = gcn_norm_adj(edge_index, N_NODES)
    ref_bf16 = ref_forward_bf16_matched(x, batch_vec, adj_ref, noise, desired_label, params)
    ref_f32 = ref_forward_f32(x, batch_vec, adj_ref, noise, desired_label, params)

    assert out.shape == (N_NODES, DIM_OUT)
    assert jnp.allclose(out, ref_bf16, atol=2e-3, rtol=2e-3)
    assert jnp.allclose(out, ref_f32, atol=1e-1, rtol=1e-1)

    print("KERNEL_OK")
</pallas_src>

<mosaic_0001>
module attributes {stable_mosaic.version = 11 : i64} {
  func.func @generator_kernel(%arg0: memref<3xf32, #tpu.memory_space<smem>>, %arg1: memref<16x19xf32, #tpu.memory_space<vmem>>, %arg2: memref<16x1xi32, #tpu.memory_space<vmem>>, %arg3: memref<8x13xf32, #tpu.memory_space<vmem>>, %arg4: memref<16x16xf32, #tpu.memory_space<vmem>>, %arg5: memref<4x128x128xbf16, #tpu.memory_space<vmem>>, %arg6: memref<16x128xf32, #tpu.memory_space<vmem>>) attributes {dimension_semantics = [], scalar_prefetch = 0 : i64, scratch_operands = 0 : i64, tpu.core_type = #tpu.core_type<tc>} {
    %c0 = arith.constant 0 : index
    %c0_0 = arith.constant 0 : index
    %c0_1 = arith.constant 0 : index
    %0 = vector.load %arg5[%c0, %c0_0, %c0_1] : memref<4x128x128xbf16, #tpu.memory_space<vmem>>, vector<1x128x128xbf16>
    %1 = vector.shape_cast %0 : vector<1x128x128xbf16> to vector<128x128xbf16>
    %2 = vector.extract_strided_slice %1 {offsets = [0, 0], sizes = [19, 128], strides = [1, 1]} : vector<128x128xbf16> to vector<19x128xbf16>
    %3 = vector.extract_strided_slice %1 {offsets = [32, 0], sizes = [13, 128], strides = [1, 1]} : vector<128x128xbf16> to vector<13x128xbf16>
    %4 = vector.extract_strided_slice %1 {offsets = [120, 0], sizes = [1, 128], strides = [1, 1]} : vector<128x128xbf16> to vector<1x128xbf16>
    %5 = arith.extf %4 : vector<1x128xbf16> to vector<1x128xf32>
    %6 = tpu.iota {dimensions = array<i32: 1>} : vector<16x8xi32>
    %c0_2 = arith.constant 0 : index
    %c0_3 = arith.constant 0 : index
    %7 = vector.load %arg2[%c0_2, %c0_3] : memref<16x1xi32, #tpu.memory_space<vmem>>, vector<16x1xi32>
    %8 = vector.broadcast %7 : vector<16x1xi32> to vector<16x8xi32>
    %9 = arith.cmpi eq, %8, %6 : vector<16x8xi32>
    %10 = arith.extui %9 : vector<16x8xi1> to vector<16x8xi32>
    %11 = arith.sitofp %10 : vector<16x8xi32> to vector<16x8xf32>
    %c0_4 = arith.constant 0 : index
    %c0_5 = arith.constant 0 : index
    %12 = vector.load %arg3[%c0_4, %c0_5] : memref<8x13xf32, #tpu.memory_space<vmem>>, vector<8x13xf32>
    %13 = arith.truncf %12 : vector<8x13xf32> to vector<8x13xbf16>
    %cst = arith.constant dense<0.000000e+00> : vector<8x128xf32>
    %14 = tpu.matmul %13, %3, %cst {dimension_numbers = #tpu.dot_dimension_numbers<[1], [0], [0], [1], [0, 0, 1, 1], [], []>} : vector<8x13xbf16>, vector<13x128xbf16>, vector<8x128xf32> -> vector<8x128xf32>
    %c0_6 = arith.constant 0 : index
    %c0_7 = arith.constant 0 : index
    %15 = vector.load %arg1[%c0_6, %c0_7] : memref<16x19xf32, #tpu.memory_space<vmem>>, vector<16x19xf32>
    %16 = arith.truncf %15 : vector<16x19xf32> to vector<16x19xbf16>
    %cst_8 = arith.constant dense<0.000000e+00> : vector<16x128xf32>
    %17 = tpu.matmul %16, %2, %cst_8 {dimension_numbers = #tpu.dot_dimension_numbers<[1], [0], [0], [1], [0, 0, 1, 1], [], []>} : vector<16x19xbf16>, vector<19x128xbf16>, vector<16x128xf32> -> vector<16x128xf32>
    %cst_9 = arith.constant dense<0.000000e+00> : vector<16x128xf32>
    %18 = tpu.matmul %11, %14, %cst_9 {dimension_numbers = #tpu.dot_dimension_numbers<[1], [0], [0], [1], [0, 0, 1, 1], [], []>} : vector<16x8xf32>, vector<8x128xf32>, vector<16x128xf32> -> vector<16x128xf32>
    %19 = arith.addf %17, %18 : vector<16x128xf32>
    %c0_10 = arith.constant 0 : index
    %20 = memref.load %arg0[%c0_10] : memref<3xf32, #tpu.memory_space<smem>>
    %cst_11 = arith.constant 0.000000e+00 : f32
    %21 = vector.broadcast %cst_11 : f32 to vector<16x128xf32>
    %22 = arith.cmpf ogt, %19, %21 : vector<16x128xf32>
    %23 = vector.broadcast %20 : f32 to vector<16x128xf32>
    %24 = arith.mulf %23, %19 : vector<16x128xf32>
    %25 = arith.select %22, %19, %24 : vector<16x128xi1>, vector<16x128xf32>
    %c0_12 = arith.constant 0 : index
    %c0_13 = arith.constant 0 : index
    %26 = vector.load %arg4[%c0_12, %c0_13] : memref<16x16xf32, #tpu.memory_space<vmem>>, vector<16x16xf32>
    %27 = arith.truncf %26 : vector<16x16xf32> to vector<16x16xbf16>
    %c1 = arith.constant 1 : index
    %c0_14 = arith.constant 0 : index
    %c0_15 = arith.constant 0 : index
    %28 = vector.load %arg5[%c1, %c0_14, %c0_15] : memref<4x128x128xbf16, #tpu.memory_space<vmem>>, vector<1x128x128xbf16>
    %29 = vector.shape_cast %28 : vector<1x128x128xbf16> to vector<128x128xbf16>
    %c1_16 = arith.constant 1 : index
    %30 = memref.load %arg0[%c1_16] : memref<3xf32, #tpu.memory_space<smem>>
    %31 = arith.truncf %25 : vector<16x128xf32> to vector<16x128xbf16>
    %cst_17 = arith.constant dense<0.000000e+00> : vector<16x128xf32>
    %32 = tpu.matmul %27, %31, %cst_17 {dimension_numbers = #tpu.dot_dimension_numbers<[1], [0], [0], [1], [0, 0, 1, 1], [], []>} : vector<16x16xbf16>, vector<16x128xbf16>, vector<16x128xf32> -> vector<16x128xf32>
    %33 = arith.truncf %32 : vector<16x128xf32> to vector<16x128xbf16>
    %cst_18 = arith.constant dense<0.000000e+00> : vector<16x128xf32>
    %34 = tpu.matmul %33, %29, %cst_18 {dimension_numbers = #tpu.dot_dimension_numbers<[1], [0], [0], [1], [0, 0, 1, 1], [], []>} : vector<16x128xbf16>, vector<128x128xbf16>, vector<16x128xf32> -> vector<16x128xf32>
    %cst_19 = arith.constant 0.000000e+00 : f32
    %35 = vector.broadcast %cst_19 : f32 to vector<16x128xf32>
    %36 = arith.cmpf ogt, %34, %35 : vector<16x128xf32>
    %37 = vector.broadcast %30 : f32 to vector<16x128xf32>
    %38 = arith.mulf %37, %34 : vector<16x128xf32>
    %39 = arith.select %36, %34, %38 : vector<16x128xi1>, vector<16x128xf32>
    %c2 = arith.constant 2 : index
    %c0_20 = arith.constant 0 : index
    %c0_21 = arith.constant 0 : index
    %40 = vector.load %arg5[%c2, %c0_20, %c0_21] : memref<4x128x128xbf16, #tpu.memory_space<vmem>>, vector<1x128x128xbf16>
    %41 = vector.shape_cast %40 : vector<1x128x128xbf16> to vector<128x128xbf16>
    %c2_22 = arith.constant 2 : index
    %42 = memref.load %arg0[%c2_22] : memref<3xf32, #tpu.memory_space<smem>>
    %43 = arith.truncf %39 : vector<16x128xf32> to vector<16x128xbf16>
    %cst_23 = arith.constant dense<0.000000e+00> : vector<16x128xf32>
    %44 = tpu.matmul %27, %43, %cst_23 {dimension_numbers = #tpu.dot_dimension_numbers<[1], [0], [0], [1], [0, 0, 1, 1], [], []>} : vector<16x16xbf16>, vector<16x128xbf16>, vector<16x128xf32> -> vector<16x128xf32>
    %45 = arith.truncf %44 : vector<16x128xf32> to vector<16x128xbf16>
    %cst_24 = arith.constant dense<0.000000e+00> : vector<16x128xf32>
    %46 = tpu.matmul %45, %41, %cst_24 {dimension_numbers = #tpu.dot_dimension_numbers<[1], [0], [0], [1], [0, 0, 1, 1], [], []>} : vector<16x128xbf16>, vector<128x128xbf16>, vector<16x128xf32> -> vector<16x128xf32>
    %cst_25 = arith.constant 0.000000e+00 : f32
    %47 = vector.broadcast %cst_25 : f32 to vector<16x128xf32>
    %48 = arith.cmpf ogt, %46, %47 : vector<16x128xf32>
    %49 = vector.broadcast %42 : f32 to vector<16x128xf32>
    %50 = arith.mulf %49, %46 : vector<16x128xf32>
    %51 = arith.select %48, %46, %50 : vector<16x128xi1>, vector<16x128xf32>
    %52 = arith.truncf %51 : vector<16x128xf32> to vector<16x128xbf16>
    %c3 = arith.constant 3 : index
    %c0_26 = arith.constant 0 : index
    %c0_27 = arith.constant 0 : index
    %53 = vector.load %arg5[%c3, %c0_26, %c0_27] : memref<4x128x128xbf16, #tpu.memory_space<vmem>>, vector<1x128x128xbf16>
    %54 = vector.shape_cast %53 : vector<1x128x128xbf16> to vector<128x128xbf16>
    %cst_28 = arith.constant dense<0.000000e+00> : vector<16x128xf32>
    %55 = tpu.matmul %52, %54, %cst_28 {dimension_numbers = #tpu.dot_dimension_numbers<[1], [0], [0], [1], [0, 0, 1, 1], [], []>} : vector<16x128xbf16>, vector<128x128xbf16>, vector<16x128xf32> -> vector<16x128xf32>
    %56 = vector.broadcast %5 : vector<1x128xf32> to vector<16x128xf32>
    %57 = arith.addf %55, %56 : vector<16x128xf32>
    %c0_29 = arith.constant 0 : index
    %c0_30 = arith.constant 0 : index
    %58 = vector.load %arg6[%c0_29, %c0_30] : memref<16x128xf32, #tpu.memory_space<vmem>>, vector<16x128xf32>
    tpu.vector_store %arg6[%c0_29, %c0_30], %57 {strides = array<i32>} : memref<16x128xf32, #tpu.memory_space<vmem>>, vector<16x128xf32>,
    return
  }
}

</mosaic_0001>

<bundles_post_ra>
// kernel: gan_generator_forward.1
= control target key start
LH: loop header
LB: loop body
LE: loop exit
PB: predicated region body
PF: predicated region fallthrough
CT: control target
= control target key end

     0   :  { %11 = vsyncpa [#allocation4], 0  ;;  %s1101_s0 = inlined_call_operand.vmem [shape: f32[3], index: 0, kind: input, shape index: {}]   ;;  %s1102_s1 = inlined_call_operand.vmem [shape: f32[16,19], index: 1, kind: input, shape index: {}]   ;;  %s1103_s2 = inlined_call_operand.vmem [shape: s32[16,1], index: 2, kind: input, shape index: {}]   ;;  %s1104_s3 = inlined_call_operand.vmem [shape: f32[8,13], index: 3, kind: input, shape index: {}]   ;;  %s1105_s4 = inlined_call_operand.vmem [shape: f32[16,16], index: 4, kind: input, shape index: {}]   ;;  %s1106_s5 = inlined_call_operand.hbm [shape: bf16[4,128,128], index: 5, kind: input, shape index: {}]   ;;  %s1107_s6 = inlined_call_operand.vmem [shape: f32[16,128], index: 6, kind: output, shape index: {}]  }
   0x1   :  { %s19_s23 = sshll.u32 %s1101_s0, 4  ;;  %s20_s23 = int_to_ptr.vmem [resolvable:$true] %s19_s23 }
   0x2   :  { %12 = vsyncpa [#allocation3], 0  ;;  %s929_s24 = scalar_lea.vmem %s20_s23, 16  ;;  %p934_p1 = scmp.lt.s32.totalorder %s20_s23, %s20_s23 }
   0x3   :  { %p930_p0 = scmp.ne.s32.totalorder %s20_s23, %s929_s24  ;;  %p935_p2 = scmp.lt.s32.totalorder %s929_s24, %s929_s24 }
   0x5   :  { %p936_p3 = por %p935_p2, %p934_p1 }
   0x7   :  { %p937_p4 = pnand %p936_p3, %p930_p0 }
   0x9   :  { %940 = shalt.err (!%p937_p4)
}
   0xa   :  { %s967_s25 = smov [#allocation2]   ;;  %s968_s26 = smov [#allocation5]  }
   0xb   :  { %22 = dma.vmem_to_smem %s20_s23, 16, %s967_s25, [#allocation4]  }
   0xc   :  { %s36_s27 = sshll.u32 %s968_s26, 4  ;;  %s941_s30 = scalar_lea.hbm %s1106_s5, 4096  ;;  %s37_s27 = int_to_ptr.vmem [resolvable:$true] %s36_s27 }
   0xd   :  { %p942_p5 = scmp.ne.s32.totalorder %s1106_s5, %s941_s30  ;;  %p945_p6 = scmp.lt.u32.totalorder %s941_s30, %s1106_s5 }
   0xf   :  { %p947_p7 = pnand %p945_p6, %p942_p5 }
  0x11   :  { %950 = shalt.err (!%p947_p7)
}
  0x12   :  { %s951_s10 = scalar_lea.vmem %s37_s27, 4096  ;;  %p956_p9 = scmp.lt.s32.totalorder %s37_s27, %s37_s27 }
  0x13   :  { %p952_p8 = scmp.ne.s32.totalorder %s37_s27, %s951_s10  ;;  %p957_p10 = scmp.lt.s32.totalorder %s951_s10, %s951_s10 }
  0x15   :  { %p958_p11 = por %p957_p10, %p956_p9 }
  0x17   :  { %p959_p12 = pnand %p958_p11, %p952_p8 }
  0x19   :  { %962 = shalt.err (!%p959_p12)
}
  0x1a   :  { %s969_s11 = smov 64   ;;  %s970_s12 = smov 4  }
  0x1b   :  { %42 = dma.hbm_to_vmem [thread:$0]  %s1106_s5, 4096, %s37_s27, [#allocation3], %s969_s11, %s969_s11, %s970_s12  }
  0x1c   :  { %963 = dma.done.wait [#allocation4], 16  }
  0x1d   :  { %964 = vsyncadd [#allocation4], 4294967280 }
  0x1e   :  { %965 = dma.done.wait [#allocation3], 4096  }
  0x1f   :  { %966 = vsyncadd [#allocation3], 4294963200 }
  0x20   :  { %49 = sfence }
  0x21   :  { %v902_v0 = vld [vmem:[#allocation5 + $0x10] sm:$0xff]   ;;  %v971_v1 = vmov 0.0   ;;  %vm85_vm0 = vcmask 1045504   ;;  %vm86_vm1 = vcmask 1046528   ;;  %vm230_vm2 = vcmask 1040384   ;;  %v74_v4 = vld [vmem:[%s1104_s3] sm:$0xff] }
  0x22   :  { %802 = vmatprep.subr.bf16.mxu0 %v971_v1  ;;  %v972_v2 = vmov 65535   ;;  %vm231_vm3 = vcmask 1041408   ;;  %vm973_vm4 = vmmov 0   ;;  %v60_v6 = vld [vmem:[%s1103_s2] sm:$0xff]  ;;  %v75_v9 = vpack.c.bf16 %v74_v4, %v74_v4  ;;  %v61_v13 = vld [vmem:[%s1103_s2 + $0x8] sm:$0xff]  ;;  %v907_v35 = vld [vmem:[#allocation5 + $0x50] sm:$0xff]  }
  0x23   :  { %v87_v3 = vsel %vm85_vm0, 4294967295, %v972_v2  ;;  %804 = vmatprep.mubr.msk.bf16.mxu0 %vm973_vm4, %v971_v1  ;;  %v232_v8 = vsel %vm230_vm2, 4294967295, %v972_v2  ;;  %v974_v10 = vmov 0   ;;  %vm81_vm5 = vcmask 105472   ;;  %v903_v11 = vld [vmem:[#allocation5] sm:$0xff]   ;;  %v133_v16 = vld [vmem:[%s1102_s1 + $0x8] sm:$0xff] }
  0x24   :  { %v88_v5 = vsel %vm86_vm1, %v87_v3, 0  ;;  %901 = vset.pattern.permute.xlu0 %v974_v10  ;;  %v233_v12 = vsel %vm231_vm3, %v232_v8, 0  ;;  %v904_v14 = vld [vmem:[#allocation5 + $0x8] ss:$0 sps:$4 sm:$0xff]   ;;  %v132_v15 = vld [vmem:[%s1102_s1] sm:$0xff]  ;;  %vm226_vm6 = vcmask 154624   ;;  %v58_v19 = vlaneseq }
  0x25   :  { %v90_v7 = vand.u32 %v902_v0, %v88_v5  ;;  %63 = vperm.xlu0 %901, %v60_v6   ;;  %v235_v17 = vand.u32 %v904_v14, %v233_v12  ;;  %v134_v18 = vpack.c.bf16 %v133_v16, %v132_v15  ;;  %vm135_vm7 = vcmask 64512   ;;  %v905_v33 = vld [vmem:[#allocation5 + $0x40] sm:$0xff]   ;;  %v906_v34 = vld [vmem:[#allocation5 + $0x48] sm:$0xff]   ;;  %v908_v36 = vld [vmem:[#allocation5 + $0x58] sm:$0xff]   ;;  %s278_s1 = sld [smem:[#allocation2]]  ;;  %s745_s26 = sld [smem:[#allocation2 + $0x2]] }
  0x26   :  { %v59_v20 = vand.u32 127, %v58_v19  ;;  %v909_v37 = vld [vmem:[#allocation5 + $0x60] sm:$0xff]   ;;  %v910_v38 = vld [vmem:[#allocation5 + $0x68] sm:$0xff]   ;;  %v911_v39 = vld [vmem:[#allocation5 + $0x70] sm:$0xff]   ;;  %vm308_vm12 = vcmask 130048  }
  0x27   :  { %803 = vmatpush3.bf16.msra.mxu0 %v90_v7  ;;  %v286_v48 = vld [vmem:[%s1105_s4] sm:$0xff]  ;;  %v287_v49 = vld [vmem:[%s1105_s4 + $0x8] sm:$0xff]  ;;  %v912_v53 = vld [vmem:[#allocation5 + $0x78] sm:$0xff]   ;;  %s735_s4 = sld [smem:[#allocation2 + $0x1]] }
  0x28   :  { %813 = vmatprep.subr.bf16.mxu0 %v971_v1  ;;  %v288_v52 = vpack.c.bf16 %v287_v49, %v286_v48  ;;  %v913_v6 = vld [vmem:[#allocation5 + $0x80] sm:$0xff]   ;;  %v914_v7 = vld [vmem:[#allocation5 + $0x88] sm:$0xff]   ;;  %v915_v8 = vld [vmem:[#allocation5 + $0x90] sm:$0xff]  }
  0x29   :  { %66 = vperm.xlu0 %901, %v61_v13   ;;  %v917_v10 = vld [vmem:[#allocation5 + $0xa0] sm:$0xff]   ;;  %v919_v12 = vld [vmem:[#allocation5 + $0xb0] sm:$0xff]   ;;  %v920_v13 = vld [vmem:[#allocation5 + $0xb8] sm:$0xff]  }
  0x2a   :  { %805 = vmatmul.mubr.msk.bf16.vlgmr.msra.gmra.mrb[0].mxu0 %vm81_vm5, %v75_v9  ;;  %v916_v9 = vld [vmem:[#allocation5 + $0x98] sm:$0xff]   ;;  %v921_v14 = vld [vmem:[#allocation5 + $0xc0] sm:$0xff]   ;;  %v922_v15 = vld [vmem:[#allocation5 + $0xc8] sm:$0xff]  }
  0x2b   :  { %814 = vmatpush3.bf16.msra.mxu0 %v903_v11  ;;  %817 = vmatprep.mubr.msk.bf16.mxu0 %vm973_vm4, %v971_v1  ;;  %v281_v41 = vstv %s278_s1  ;;  %v918_v11 = vld [vmem:[#allocation5 + $0xa8] sm:$0xff]   ;;  %v923_v16 = vld [vmem:[#allocation5 + $0xd0] sm:$0xff]  }
  0x2c   :  { %815 = vmatprep.subr.bf16.mxu0 %v971_v1 }
  0x2d   :  { %v445_v59 = vstv %s735_s4 }
  0x2f   :  { %816 = vmatpush3.bf16.msra.mxu0 %v235_v17  ;;  %v924_v17 = vld [vmem:[#allocation5 + $0xd8] sm:$0xff]  }
  0x30   :  { %821 = vmatprep.subr.bf16.mxu0 %v971_v1 }
  0x32   :  { %818 = vmatmul.mubr.msk.bf16.vlgmr.msra.gmra.mrb[4].mxu0 %vm226_vm6, %v134_v18  ;;  %v925_v18 = vld [vmem:[#allocation5 + $0xe0] sm:$0xff]  }
  0x33   :  { %823 = vmatprep.mubr.msk.bf16.mxu0 %vm973_vm4, %v971_v1 }
  0xa4   :  { %v64_v21 = vpop.permute.xlu0 %63 }
  0xa5   :  { %vm68_vm8 = vcmp.eq.s32.totalorder %v64_v21, %v59_v20 }
  0xa6   :  { %v726_v22 = vsel %vm68_vm8, 1.0, %v971_v1 }
  0xa7   :  { %810 = vmatprep.mubr.msk.f32.mxu1 %vm135_vm7, %v726_v22 }
  0xa8   :  { %v67_v23 = vpop.permute.xlu0 %66 }
  0xa9   :  { %vm69_vm9 = vcmp.eq.s32.totalorder %v67_v23, %v59_v20  ;;  %v926_v20 = vld [vmem:[#allocation5 + $0xe8] sm:$0xff]  }
  0xaa   :  { %v727_v26 = vsel %vm69_vm9, 1.0, %v971_v1 }
  0xfd   :  { %v126_v24 = vpop.f32.mrb[0].mxu0 }
  0xfe   :  { %v806_v25 = vpop.f32.mrb[1].mxu0  ;;  %808 = vmatprep.subr.mxu1 %v126_v24 }
  0xff   :  { %v129_v27 = vpop.f32.mrb[2].mxu0  ;;  %809 = vmatpush3.msra.mxu1 %v126_v24 }
 0x100   :  { %v807_v28 = vpop.f32.mrb[3].mxu0  ;;  %811 = vmatmul.mubr.msk.f32.vlgmr.msra.gmra.mrb[0].mxu1 %vm135_vm7, %v727_v26  ;;  %827 = vmatprep.subr.bf16.mxu1 %v971_v1  ;;  %v927_v26 = vld [vmem:[#allocation5 + $0xf0] sm:$0xff]   ;;  %v928_v27 = vld [vmem:[#allocation5 + $0xf8] sm:$0xff]  }
 0x101   :  { %843 = vmatprep.mubr.msk.bf16.mxu1 %vm973_vm4, %v971_v1  ;;  %828 = vmatpush3.bf16.msra.mxu1 %v905_v33  ;;  %v602_v28 = vstv %s745_s26 }
 0x102   :  { %829 = vmatprep.subr.bf16.mxu1 %v971_v1 }
 0x105   :  { %v271_v29 = vpop.f32.mrb[4].mxu0  ;;  %830 = vmatpush3.bf16.msra.mxu1 %v906_v34 }
 0x106   :  { %v819_v30 = vpop.f32.mrb[5].mxu0  ;;  %831 = vmatprep.subr.bf16.mxu1 %v971_v1 }
 0x107   :  { %v274_v31 = vpop.f32.mrb[6].mxu0 }
 0x108   :  { %v820_v32 = vpop.f32.mrb[7].mxu0 }
 0x109   :  { %832 = vmatpush3.bf16.msra.mxu1 %v907_v35 }
 0x10a   :  { %833 = vmatprep.subr.bf16.mxu1 %v971_v1 }
 0x10d   :  { %834 = vmatpush3.bf16.msra.mxu1 %v908_v36 }
 0x10e   :  { %835 = vmatprep.subr.bf16.mxu1 %v971_v1 }
 0x111   :  { %836 = vmatpush3.bf16.msra.mxu1 %v909_v37 }
 0x112   :  { %837 = vmatprep.subr.bf16.mxu1 %v971_v1 }
 0x115   :  { %838 = vmatpush3.bf16.msra.mxu1 %v910_v38  ;;  %v626_v38 = vshrl.u32 %v58_v19, 7 }
 0x116   :  { %839 = vmatprep.subr.bf16.mxu1 %v971_v1 }
 0x119   :  { %840 = vmatpush3.bf16.msra.mxu1 %v911_v39  ;;  %v56_v39 = vld [vmem:[#allocation5 + $0x3c] sm:$0xf] }
 0x11a   :  { %841 = vmatprep.subr.bf16.mxu1 %v971_v1 }
 0x11d   :  { %842 = vmatpush3.bf16.msra.mxu1 %v912_v53 }
 0x11e   :  { %873 = vmatprep.subr.bf16.mxu1 %v971_v1 }
 0x1d3   :  { %v812_v40 = vpop.f32.mrb[0].mxu1 }
 0x1d4   :  { %v275_v42 = vadd.f32 %v812_v40, %v274_v31  ;;  %v208_v43 = vpop.f32.mrb[1].mxu1  ;;  %v627_v40 = vsub.s32 0, %v626_v38 }
 0x1d5   :  { %v272_v44 = vadd.f32 %v271_v29, %v208_v43 }
 0x1d6   :  { %vm280_vm10 = vcmp.gt.f32.partialorder %v275_v42, 0.0  ;;  %v283_v45 = vmul.f32 %v281_v41, %v275_v42 }
 0x1d7   :  { %vm279_vm11 = vcmp.gt.f32.partialorder %v272_v44, 0.0  ;;  %v282_v46 = vmul.f32 %v281_v41, %v272_v44 }
 0x1d8   :  { %v285_v47 = vsel %vm280_vm10, %v275_v42, %v283_v45 }
 0x1d9   :  { %v284_v50 = vsel %vm279_vm11, %v272_v44, %v282_v46 }
 0x1da   :  { %v307_v51 = vpack.c.bf16 %v285_v47, %v284_v50 }
 0x1dc   :  { %822 = vmatpush3.bf16.msra.mxu0 %v307_v51 }
 0x1dd   :  { %847 = vmatprep.subr.bf16.mxu0 %v971_v1 }
 0x1df   :  { %824 = vmatmul.mubr.msk.bf16.vlgmr.msra.gmra.mrb[8].mxu0 %vm308_vm12, %v288_v52 }
 0x1e0   :  { %849 = vmatprep.mubr.msk.bf16.mxu0 %vm973_vm4, %v971_v1 }
 0x2b2   :  { %v346_v54 = vpop.f32.mrb[8].mxu0 }
 0x2b3   :  { %v825_v55 = vpop.f32.mrb[9].mxu0 }
 0x2b4   :  { %v349_v56 = vpop.f32.mrb[10].mxu0 }
 0x2b5   :  { %v353_v57 = vpack.c.bf16 %v349_v56, %v346_v54  ;;  %v826_v58 = vpop.f32.mrb[11].mxu0 }
 0x2b7   :  { %844 = vmatmul.mubr.bf16.vlgmr.msra.gmra.mrb[4].mxu1 %v353_v57 }
 0x2b8   :  { %889 = vmatprep.mubr.msk.bf16.mxu1 %vm973_vm4, %v971_v1  ;;  %874 = vmatpush3.bf16.msra.mxu1 %v921_v14 }
 0x2b9   :  { %875 = vmatprep.subr.bf16.mxu1 %v971_v1 }
 0x2bc   :  { %876 = vmatpush3.bf16.msra.mxu1 %v922_v15 }
 0x2bd   :  { %877 = vmatprep.subr.bf16.mxu1 %v971_v1 }
 0x2c0   :  { %878 = vmatpush3.bf16.msra.mxu1 %v923_v16 }
 0x2c1   :  { %879 = vmatprep.subr.bf16.mxu1 %v971_v1 }
 0x2c4   :  { %880 = vmatpush3.bf16.msra.mxu1 %v924_v17 }
 0x2c5   :  { %881 = vmatprep.subr.bf16.mxu1 %v971_v1 }
 0x2c8   :  { %882 = vmatpush3.bf16.msra.mxu1 %v925_v18 }
 0x2c9   :  { %883 = vmatprep.subr.bf16.mxu1 %v971_v1 }
 0x2cc   :  { %884 = vmatpush3.bf16.msra.mxu1 %v926_v20 }
 0x2cd   :  { %885 = vmatprep.subr.bf16.mxu1 %v971_v1 }
 0x2d0   :  { %886 = vmatpush3.bf16.msra.mxu1 %v927_v26 }
 0x2d1   :  { %887 = vmatprep.subr.bf16.mxu1 %v971_v1 }
 0x2d4   :  { %888 = vmatpush3.bf16.msra.mxu1 %v928_v27 }
 0x38a   :  { %v436_v60 = vpop.f32.mrb[4].mxu1 }
 0x38b   :  { %v446_v61 = vmul.f32 %v445_v59, %v436_v60  ;;  %v845_v62 = vpop.f32.mrb[5].mxu1  ;;  %vm443_vm13 = vcmp.gt.f32.partialorder %v436_v60, 0.0 }
 0x38c   :  { %v439_v63 = vpop.f32.mrb[6].mxu1 }
 0x38d   :  { %vm444_vm14 = vcmp.gt.f32.partialorder %v439_v63, 0.0  ;;  %v447_v0 = vmul.f32 %v445_v59, %v439_v63  ;;  %v846_v2 = vpop.f32.mrb[7].mxu1  ;;  %v448_v3 = vsel %vm443_vm13, %v436_v60, %v446_v61 }
 0x38f   :  { %v449_v4 = vsel %vm444_vm14, %v439_v63, %v447_v0 }
 0x390   :  { %v468_v5 = vpack.c.bf16 %v449_v4, %v448_v3 }
 0x392   :  { %848 = vmatpush3.bf16.msra.mxu0 %v468_v5 }
 0x393   :  { %853 = vmatprep.subr.bf16.mxu0 %v971_v1 }
 0x395   :  { %850 = vmatmul.mubr.msk.bf16.vlgmr.msra.gmra.mrb[12].mxu0 %vm308_vm12, %v288_v52 }
 0x396   :  { %854 = vmatpush3.bf16.msra.mxu0 %v913_v6  ;;  %869 = vmatprep.mubr.msk.bf16.mxu0 %vm973_vm4, %v971_v1 }
 0x397   :  { %855 = vmatprep.subr.bf16.mxu0 %v971_v1 }
 0x39a   :  { %856 = vmatpush3.bf16.msra.mxu0 %v914_v7 }
 0x39b   :  { %857 = vmatprep.subr.bf16.mxu0 %v971_v1 }
 0x39e   :  { %858 = vmatpush3.bf16.msra.mxu0 %v915_v8 }
 0x39f   :  { %859 = vmatprep.subr.bf16.mxu0 %v971_v1 }
 0x3a2   :  { %860 = vmatpush3.bf16.msra.mxu0 %v916_v9 }
 0x3a3   :  { %861 = vmatprep.subr.bf16.mxu0 %v971_v1 }
 0x3a6   :  { %862 = vmatpush3.bf16.msra.mxu0 %v917_v10 }
 0x3a7   :  { %863 = vmatprep.subr.bf16.mxu0 %v971_v1 }
 0x3aa   :  { %864 = vmatpush3.bf16.msra.mxu0 %v918_v11 }
 0x3ab   :  { %865 = vmatprep.subr.bf16.mxu0 %v971_v1 }
 0x3ae   :  { %866 = vmatpush3.bf16.msra.mxu0 %v919_v12 }
 0x3af   :  { %867 = vmatprep.subr.bf16.mxu0 %v971_v1  ;;  %v57_v1 = vunpack.c.l.bf16 %v56_v39 }
 0x3b1   :  { %v628_v41 = vrot.slane %v57_v1, %v627_v40 }
 0x3b2   :  { %868 = vmatpush3.bf16.msra.mxu0 %v920_v13 }
 0x468   :  { %v503_v21 = vpop.f32.mrb[12].mxu0 }
 0x469   :  { %v851_v22 = vpop.f32.mrb[13].mxu0 }
 0x46a   :  { %v506_v23 = vpop.f32.mrb[14].mxu0 }
 0x46b   :  { %v510_v24 = vpack.c.bf16 %v506_v23, %v503_v21  ;;  %v852_v25 = vpop.f32.mrb[15].mxu0 }
 0x46d   :  { %870 = vmatmul.mubr.bf16.vlgmr.msra.gmra.mrb[16].mxu0 %v510_v24 }
 0x540   :  { %v593_v29 = vpop.f32.mrb[16].mxu0 }
 0x541   :  { %v603_v30 = vmul.f32 %v602_v28, %v593_v29  ;;  %v871_v31 = vpop.f32.mrb[17].mxu0  ;;  %vm600_vm15 = vcmp.gt.f32.partialorder %v593_v29, 0.0 }
 0x542   :  { %v596_v32 = vpop.f32.mrb[18].mxu0 }
 0x543   :  { %vm601_vm0 = vcmp.gt.f32.partialorder %v596_v32, 0.0  ;;  %v604_v33 = vmul.f32 %v602_v28, %v596_v32  ;;  %v872_v34 = vpop.f32.mrb[19].mxu0  ;;  %v605_v35 = vsel %vm600_vm15, %v593_v29, %v603_v30 }
 0x545   :  { %v606_v36 = vsel %vm601_vm0, %v596_v32, %v604_v33 }
 0x546   :  { %v607_v37 = vpack.c.bf16 %v606_v36, %v605_v35 }
 0x548   :  { %890 = vmatmul.mubr.bf16.vlgmr.msra.gmra.mrb[8].mxu1 %v607_v37 }
 0x61b   :  { %v711_v42 = vpop.f32.mrb[8].mxu1 }
 0x61c   :  { %v712_v43 = vadd.f32 %v711_v42, %v628_v41  ;;  %v891_v44 = vpop.f32.mrb[9].mxu1 }
 0x61d   :  { %v714_v45 = vpop.f32.mrb[10].mxu1 }
 0x61e   :  { %718 = vst [vmem:[%s1107_s6] sm:$0xff] %v712_v43  ;;  %v715_v46 = vadd.f32 %v714_v45, %v628_v41  ;;  %v892_v47 = vpop.f32.mrb[11].mxu1 }
 0x620   :  { %719 = vst [vmem:[%s1107_s6 + $0x8] sm:$0xff] %v715_v46 }
 0x621   :  { %724 = vsyncpa [#allocation3], 1 }
 0x622   :  { %725 = vsyncpa [#allocation4], 1 }

</bundles_post_ra>
